<compile_context>
chip_gen: v6e
topology: v6e:2x2x1
jax: 0.10.0
libtpu: 0.0.40
codegen_flags: <defaults>
</compile_context>

<pallas_src>
import functools

import jax
import jax.numpy as jnp
from jax import lax
from jax.experimental import pallas as pl
from jax.experimental.pallas import tpu as pltpu

K = 9
PAD = K // 2

# ------------------------------------------------------------------------------------
# pltpu.roll direction probe (one-time).  pltpu.roll is specified to match jnp.roll
# (result[i] = x[i - shift]); the convolution tap direction depends on that sign, so we
# probe once on-device instead of trusting the convention across jax versions.
# ------------------------------------------------------------------------------------
_ROLL_SIGN = None


def _roll_sign():
    global _ROLL_SIGN
    if _ROLL_SIGN is None:
        def probe(x_ref, o_ref):
            o_ref[...] = pltpu.roll(x_ref[...], 3, 1)

        x = jnp.arange(8 * 128, dtype=jnp.float32).reshape(8, 128)
        y = pl.pallas_call(
            probe, out_shape=jax.ShapeDtypeStruct((8, 128), jnp.float32))(x)
        _ROLL_SIGN = 1 if bool(jnp.array_equal(y, jnp.roll(x, 3, axis=1))) else -1
    return _ROLL_SIGN


# ------------------------------------------------------------------------------------
# Kernel
# ------------------------------------------------------------------------------------
def sanet_kernel(x_ref, w11_ref, sh11_ref, w12_ref, sh12_ref,
                 w21_ref, w22_ref, bsum_ref, out_ref, *, H, W, roll_sign):
    # x_ref    : (1, C, H*W)  input block: channels on sublanes, H*W lane-dense
    # w11_ref  : (Ch, K*C)    conv1_1 im2col weights (BN scale folded), col = t*C + ci
    # sh11_ref : (Ch, 1)      conv1_1 bias + BN shift (folded)
    # w12_ref / sh12_ref      same for conv1_2
    # w21_ref  : (K, Ch)      conv2_1 per-tap per-channel weights
    # w22_ref  : (K, Ch)      conv2_2 per-tap per-channel weights
    # bsum_ref : (1,)  SMEM   conv2_1.bias + conv2_2.bias
    # out_ref  : (1, 1, H*W)  attention-map output block (lane-dense)
    HW = H * W
    x = x_ref[0]                                     # (C, HW) f32

    # Flattened-lane index helpers for the conv halo masks (computed once; JAX does
    # not CSE broadcasts, so never inside the tap loops).
    lane = lax.broadcasted_iota(jnp.int32, (1, HW), 1)
    w_idx = lane % W
    h_idx = lane // W

    def tap(v, d, step, idx, lim):
        # out[:, p] = v[:, p + d*step] when 0 <= idx[p] + d < lim, else 0.
        # `step` is 1 for taps along W, W for taps along H; d/step are static ints.
        if d == 0:
            return v
        rolled = pltpu.roll(v, (roll_sign * (-d) * step) % HW, 1)
        mask = ((idx >= -d) & (idx < lim - d)).astype(v.dtype)
        return rolled * mask

    # ---- conv1_1: (1,K) conv along W.  im2col the K taps -> one deep MXU dot. -------
    x1col = jnp.concatenate([tap(x, t - PAD, 1, w_idx, W) for t in range(K)], axis=0)
    a1 = jnp.maximum(
        jnp.dot(w11_ref[...], x1col, preferred_element_type=jnp.float32)
        + sh11_ref[...], 0.0)                        # (Ch, HW), fused BN + ReLU

    # ---- conv1_2: (K,1) conv along H.  Same with H-taps. -----------------------------
    x2col = jnp.concatenate([tap(x, t - PAD, W, h_idx, H) for t in range(K)], axis=0)
    a2 = jnp.maximum(
        jnp.dot(w12_ref[...], x2col, preferred_element_type=jnp.float32)
        + sh12_ref[...], 0.0)                        # (Ch, HW)

    # ---- conv2_1 + conv2_2 -> single-channel map. ------------------------------------
    # Contract channels first (one dot per branch, no per-tap weight broadcasts), then
    # shift + add the K single-row tap maps.
    g1 = jnp.dot(w21_ref[...], a1, preferred_element_type=jnp.float32)   # (K, HW)
    g2 = jnp.dot(w22_ref[...], a2, preferred_element_type=jnp.float32)   # (K, HW)

    c = jnp.zeros((1, HW), jnp.float32)
    for t in range(K):
        d = t - PAD
        c = c + tap(g1[t:t + 1, :], d, W, h_idx, H)   # conv2_1: (K,1) along H
        c = c + tap(g2[t:t + 1, :], d, 1, w_idx, W)   # conv2_2: (1,K) along W

    att = jax.nn.sigmoid(c + bsum_ref[0])             # (1, HW)
    out_ref[0] = att.astype(out_ref.dtype)


# ------------------------------------------------------------------------------------
# Wrapper
# ------------------------------------------------------------------------------------
def sanet_forward(x_nchw, params):
    w11m, sh11, w12m, sh12, w21m, w22m, bsum = params
    B, C, H, W = x_nchw.shape
    Ch = w11m.shape[0]
    HW = H * W
    assert HW % 128 == 0, "H*W must be a multiple of 128 for the lane-dense layout"

    # Channels stay on sublanes, H*W goes on the lane axis: contiguous reshape only.
    x_flat = x_nchw.reshape(B, C, HW).astype(jnp.float32)

    def rep(shape):
        n = len(shape)
        return pl.BlockSpec(shape, lambda b, _n=n: (0,) * _n)

    kernel = functools.partial(sanet_kernel, H=H, W=W, roll_sign=_roll_sign())

    att = pl.pallas_call(
        kernel,
        out_shape=jax.ShapeDtypeStruct((B, 1, HW), jnp.float32),
        grid_spec=pltpu.PrefetchScalarGridSpec(
            num_scalar_prefetch=0,
            grid=(B,),
            in_specs=[
                pl.BlockSpec((1, C, HW), lambda b: (b, 0, 0)),
                rep(w11m.shape), rep(sh11.shape),
                rep(w12m.shape), rep(sh12.shape),
                rep(w21m.shape), rep(w22m.shape),
                pl.BlockSpec(memory_space=pltpu.MemorySpace.SMEM),   # bsum scalar
            ],
            out_specs=pl.BlockSpec((1, 1, HW), lambda b: (b, 0, 0)),
        ),
        compiler_params=pltpu.CompilerParams(dimension_semantics=("parallel",)),
    )(x_flat, w11m, sh11, w12m, sh12, w21m, w22m, bsum)

    # channel repeat (== torch .repeat(1, Ch, 1, 1)) + NCHW expansion: free XLA broadcast.
    att = att.reshape(B, 1, H, W)
    return jnp.broadcast_to(att, (B, Ch, H, W))


# ------------------------------------------------------------------------------------
# Parameters (synthetic, torch layouts generated then folded/converted for the kernel)
# ------------------------------------------------------------------------------------
def make_params(key, C):
    Ch = C // 2
    ks = jax.random.split(key, 16)
    eps = 1e-5

    # conv1_1: Conv2d(C, Ch, (1, K)) + BN
    W11_t = jax.random.normal(ks[0], (Ch, C, 1, K), jnp.float32) * 0.1
    b11 = jax.random.normal(ks[1], (Ch,), jnp.float32) * 0.1
    g1 = 1.0 + jax.random.normal(ks[2], (Ch,), jnp.float32) * 0.05
    be1 = jax.random.normal(ks[3], (Ch,), jnp.float32) * 0.05
    m1 = jax.random.normal(ks[4], (Ch,), jnp.float32) * 0.05
    v1 = 1.0 + jnp.abs(jax.random.normal(ks[5], (Ch,), jnp.float32)) * 0.1

    # conv1_2: Conv2d(C, Ch, (K, 1)) + BN
    W12_t = jax.random.normal(ks[6], (Ch, C, K, 1), jnp.float32) * 0.1
    b12 = jax.random.normal(ks[7], (Ch,), jnp.float32) * 0.1
    g2 = 1.0 + jax.random.normal(ks[8], (Ch,), jnp.float32) * 0.05
    be2 = jax.random.normal(ks[9], (Ch,), jnp.float32) * 0.05
    m2 = jax.random.normal(ks[10], (Ch,), jnp.float32) * 0.05
    v2 = 1.0 + jnp.abs(jax.random.normal(ks[11], (Ch,), jnp.float32)) * 0.1

    # conv2_1: Conv2d(Ch, 1, (K, 1));  conv2_2: Conv2d(Ch, 1, (1, K))
    W21_t = jax.random.normal(ks[12], (1, Ch, K, 1), jnp.float32) * 0.1
    b21 = jax.random.normal(ks[13], (), jnp.float32) * 0.1
    W22_t = jax.random.normal(ks[14], (1, Ch, 1, K), jnp.float32) * 0.1
    b22 = jax.random.normal(ks[15], (), jnp.float32) * 0.1

    # Fold conv bias + inference BatchNorm: scale into weights, shift kept separately.
    s1 = g1 / jnp.sqrt(v1 + eps)
    w11m = jnp.transpose(W11_t[:, :, 0, :], (0, 2, 1)).reshape(Ch, K * C) * s1[:, None]
    sh11 = ((b11 - m1) * s1 + be1).reshape(Ch, 1)
    s2 = g2 / jnp.sqrt(v2 + eps)
    w12m = jnp.transpose(W12_t[:, :, :, 0], (0, 2, 1)).reshape(Ch, K * C) * s2[:, None]
    sh12 = ((b12 - m2) * s2 + be2).reshape(Ch, 1)

    w21m = jnp.transpose(W21_t[0, :, :, 0], (1, 0))   # (K, Ch)
    w22m = jnp.transpose(W22_t[0, :, 0, :], (1, 0))   # (K, Ch)
    bsum = (b21 + b22).reshape(1)                     # (1,) for SMEM

    return (w11m, sh11, w12m, sh12, w21m, w22m, bsum)


# ------------------------------------------------------------------------------------
# Pure-JAX reference (lax.conv_general_dilated) matching the torch forward
# ------------------------------------------------------------------------------------
def ref_forward(x_nchw, params):
    w11m, sh11, w12m, sh12, w21m, w22m, bsum = params
    B, C, H, W = x_nchw.shape
    Ch = w11m.shape[0]
    dn = ("NHWC", "HWIO", "NHWC")
    x = jnp.transpose(x_nchw, (0, 2, 3, 1)).astype(jnp.float32)

    k11 = jnp.transpose(w11m.reshape(Ch, K, C), (1, 2, 0)).reshape(1, K, C, Ch)
    k12 = jnp.transpose(w12m.reshape(Ch, K, C), (1, 2, 0)).reshape(K, 1, C, Ch)
    a1 = lax.conv_general_dilated(x, k11, (1, 1), [(0, 0), (PAD, PAD)],
                                  dimension_numbers=dn,
                                  precision=lax.Precision.HIGHEST)
    a1 = jnp.maximum(a1 + sh11.reshape(1, 1, 1, Ch), 0.0)
    a2 = lax.conv_general_dilated(x, k12, (1, 1), [(PAD, PAD), (0, 0)],
                                  dimension_numbers=dn,
                                  precision=lax.Precision.HIGHEST)
    a2 = jnp.maximum(a2 + sh12.reshape(1, 1, 1, Ch), 0.0)

    c21 = lax.conv_general_dilated(a1, w21m.reshape(K, 1, Ch, 1), (1, 1),
                                   [(PAD, PAD), (0, 0)], dimension_numbers=dn,
                                   precision=lax.Precision.HIGHEST)
    c22 = lax.conv_general_dilated(a2, w22m.reshape(1, K, Ch, 1), (1, 1),
                                   [(0, 0), (PAD, PAD)], dimension_numbers=dn,
                                   precision=lax.Precision.HIGHEST)
    att = jax.nn.sigmoid(c21 + c22 + bsum[0])         # (B, H, W, 1)
    att = jnp.transpose(att, (0, 3, 1, 2))             # (B, 1, H, W)
    return jnp.broadcast_to(att, (B, Ch, H, W))        # == .repeat(1, Ch, 1, 1)


if __name__ == "__main__":
    B, C, H, W = 2, 8, 16, 16   # in_dim = 8 -> dim // 2 = 4
    key = jax.random.PRNGKey(0)
    pkey, xkey = jax.random.split(key)
    params = make_params(pkey, C)
    x = jax.random.normal(xkey, (B, C, H, W), jnp.float32)

    out = sanet_forward(x, params)
    out = jax.block_until_ready(out)

    ref = ref_forward(x, params)
    assert out.shape == (B, C // 2, H, W), out.shape
    err = float(jnp.max(jnp.abs(out - ref)))
    assert jnp.allclose(out, ref, atol=1e-2, rtol=1e-2), f"max abs err {err}"
    print("KERNEL_OK")
</pallas_src>

<mosaic_0001>
module attributes {stable_mosaic.version = 11 : i64} {
  func.func @probe(%arg0: memref<8x128xf32, #tpu.memory_space<vmem>>, %arg1: memref<8x128xf32, #tpu.memory_space<vmem>>) attributes {dimension_semantics = [], scalar_prefetch = 0 : i64, scratch_operands = 0 : i64, tpu.core_type = #tpu.core_type<tc>} {
    %c0 = arith.constant 0 : index
    %c0_0 = arith.constant 0 : index
    %0 = vector.load %arg0[%c0, %c0_0] : memref<8x128xf32, #tpu.memory_space<vmem>>, vector<8x128xf32>
    %c3_i32 = arith.constant 3 : i32
    %1 = tpu.dynamic_rotate %0 by %c3_i32 dim 1 : vector<8x128xf32>, i32 -> vector<8x128xf32>
    %c0_1 = arith.constant 0 : index
    %c0_2 = arith.constant 0 : index
    %2 = vector.load %arg1[%c0_1, %c0_2] : memref<8x128xf32, #tpu.memory_space<vmem>>, vector<8x128xf32>
    tpu.vector_store %arg1[%c0_1, %c0_2], %1 {strides = array<i32>} : memref<8x128xf32, #tpu.memory_space<vmem>>, vector<8x128xf32>,
    return
  }
}

</mosaic_0001>

<bundles_post_ra>
// kernel: tpu_custom_call.1
= control target key start
LH: loop header
LB: loop body
LE: loop exit
PB: predicated region body
PF: predicated region fallthrough
CT: control target
= control target key end

     0   :  { %6 = vsyncpa [#allocation3], 0  ;;  %s106_s0 = inlined_call_operand.hbm [shape: f32[8,128], index: 0, kind: input, shape index: {}]   ;;  %s107_s1 = inlined_call_operand.hbm [shape: f32[8,128], index: 1, kind: output, shape index: {}]  }
   0x1   :  { %7 = vsyncpa [#allocation4], 0  ;;  %s87_s6 = smov [#allocation2]  }
   0x2   :  { %s14_s7 = sshll.u32 %s87_s6, 4  ;;  %s15_s7 = int_to_ptr.vmem [resolvable:$true] %s14_s7 }
   0x3   :  { %s51_s8 = scalar_lea.vmem %s15_s7, 128  ;;  %p56_p1 = scmp.lt.s32.totalorder %s15_s7, %s15_s7 }
   0x4   :  { %p52_p0 = scmp.ne.s32.totalorder %s15_s7, %s51_s8  ;;  %p57_p2 = scmp.lt.s32.totalorder %s51_s8, %s51_s8 }
   0x6   :  { %p58_p3 = por %p57_p2, %p56_p1 }
   0x8   :  { %p59_p4 = pnand %p58_p3, %p52_p0 }
   0xa   :  { %62 = shalt.err (!%p59_p4)
}
   0xb   :  { %17 = dma.hbm_to_vmem [thread:$0]  %s106_s0, 128, %s15_s7, [#allocation3]  }
   0xc   :  { %83 = dma.done.wait [#allocation3], 128  }
   0xd   :  { %84 = vsyncadd [#allocation3], 4294967168  ;;  %v21_v0 = vld [vmem:[#allocation2] sm:$0xff]  ;;  %s88_s11 = smov 3   ;;  %s89_s12 = smov [#allocation5]  }
   0xe   :  { %22 = vrot.lane.b32.xlu0 %v21_v0, %s88_s11  ;;  %s31_s13 = sshll.u32 %s89_s12, 4  ;;  %s32_s13 = int_to_ptr.vmem [resolvable:$true] %s31_s13 }
   0xf   :  { %s63_s14 = scalar_lea.vmem %s32_s13, 128  ;;  %p68_p6 = scmp.lt.s32.totalorder %s32_s13, %s32_s13 }
  0x10   :  { %p64_p5 = scmp.ne.s32.totalorder %s32_s13, %s63_s14  ;;  %p69_p7 = scmp.lt.s32.totalorder %s63_s14, %s63_s14 }
  0x12   :  { %p70_p8 = por %p69_p7, %p68_p6 }
  0x14   :  { %p71_p9 = pnand %p70_p8, %p64_p5 }
  0x80   :  { %v23_v1 = vpop.permute.xlu0 %22 }
  0x81   :  { %24 = vst [vmem:[#allocation5] sm:$0xff] %v23_v1 }
  0x82   :  { %74 = shalt.err (!%p71_p9)
}
  0x83   :  { %34 = dma.vmem_to_hbm [thread:$0]  %s32_s13, 128, %s107_s1, [#allocation4]  }
  0x84   :  { %85 = dma.done.wait [#allocation4], 128  }
  0x85   :  { %86 = vsyncadd [#allocation4], 4294967168 }
  0x86   :  { %38 = vsyncpa [#allocation3], 1 }
  0x87   :  { %39 = vsyncpa [#allocation4], 1 }

</bundles_post_ra>
